<compile_context>
chip_gen: v6e
topology: v6e:2x2x1
jax: 0.10.0
libtpu: 0.0.40
codegen_flags: <defaults>
</compile_context>

<pallas_src>
import functools

import jax
import jax.numpy as jnp
from jax.experimental import pallas as pl
from jax.experimental.pallas import tpu as pltpu

# Fixed (non-learned) filter weights, identical to the PyTorch module.
KERNEL_X = (1.0 / 32.0) * jnp.array(
    [[-3.0, 0.0, 3.0], [-10.0, 0.0, 10.0], [-3.0, 0.0, 3.0]], dtype=jnp.float32)
KERNEL_Y = (1.0 / 32.0) * jnp.array(
    [[-3.0, -10.0, -3.0], [0.0, 0.0, 0.0], [3.0, 10.0, 3.0]], dtype=jnp.float32)

_C3 = 3.0 / 32.0
_C10 = 10.0 / 32.0


# --------------------------------------------------------------------------
# Shift helpers (roll fast path + slice/concat fallback).
# --------------------------------------------------------------------------
def _col_neighbors(a, reflect, use_roll):
    """x_ext[..., j-1] and x_ext[..., j+1] with reflect / zero halo columns."""
    w = a.shape[-1]
    ax = a.ndim - 1
    if use_roll:
        left_raw = pltpu.roll(a, 1, axis=ax)         # col j <- a[j-1]; col 0 bogus
        right_raw = pltpu.roll(a, w - 1, axis=ax)    # col j <- a[j+1]; col w-1 bogus
        lane = jax.lax.broadcasted_iota(jnp.int32, a.shape, ax)
        if reflect:
            left = jnp.where(lane == 0, right_raw, left_raw)        # col 0   <- a[1]
            right = jnp.where(lane == w - 1, left_raw, right_raw)   # col w-1 <- a[w-2]
        else:
            left = jnp.where(lane == 0, 0.0, left_raw)
            right = jnp.where(lane == w - 1, 0.0, right_raw)
        return left, right
    # slice + concat fallback (known-good lowering)
    if reflect:
        lpad = a[..., 1:2]
        rpad = a[..., w - 2:w - 1]
    else:
        lpad = jnp.zeros_like(a[..., :1])
        rpad = lpad
    left = jnp.concatenate([lpad, a[..., :w - 1]], axis=ax)
    right = jnp.concatenate([a[..., 1:], rpad], axis=ax)
    return left, right


def _row_shift(a, use_roll):
    """Per-tile row shifts: (value at r-1, value at r+1).

    Row 0 of the first and row th-1 of the second hold placeholder data that
    the caller ALWAYS overwrites (halo fill or global-edge fixup).
    """
    th = a.shape[1]
    if use_roll:
        return pltpu.roll(a, 1, axis=1), pltpu.roll(a, th - 1, axis=1)
    up = jnp.concatenate([a[:, :1, :], a[:, :th - 1, :]], axis=1)
    dn = jnp.concatenate([a[:, 1:, :], a[:, th - 1:th, :]], axis=1)
    return up, dn


def _apply_row_edges(up_raw, dn_raw, up_fill, dn_fill, lrow, grow,
                     tile_h, h_total, reflect, single_tile):
    """Overwrite tile-boundary rows with halo rows, then apply global edges."""
    if not single_tile:
        up_raw = jnp.where(lrow == 0, up_fill, up_raw)           # prev tile's last row
        dn_raw = jnp.where(lrow == tile_h - 1, dn_fill, dn_raw)  # next tile's first row
    if reflect:
        up = jnp.where(grow == 0, dn_raw, up_raw)                # top:    r-1 -> r+1
        dn = jnp.where(grow == h_total - 1, up_raw, dn_raw)      # bottom: r+1 -> r-1
    else:
        up = jnp.where(grow == 0, 0.0, up_raw)
        dn = jnp.where(grow == h_total - 1, 0.0, dn_raw)
    return up, dn


# --------------------------------------------------------------------------
# Kernel.
# --------------------------------------------------------------------------
def _grad_kernel(x_ref, *rest, reflect, h_total, tile_h, single_tile, use_roll):
    if single_tile:
        gx_ref, gy_ref = rest
    else:
        up_ref, dn_ref, gx_ref, gy_ref = rest

    x = x_ref[...].astype(jnp.float32)                 # (bc, tile_h, W)

    # Horizontal (lane) stencil: two column shifts of x.
    xl, xr = _col_neighbors(x, reflect, use_roll)
    dh = xr - xl                                       # horizontal central difference
    s = _C3 * (xr + xl) + _C10 * x                     # horizontal smoothing

    lrow = jax.lax.broadcasted_iota(jnp.int32, x.shape, 1)
    if single_tile:
        grow = lrow
        dh_up_f = dh_dn_f = s_up_f = s_dn_f = None
    else:
        grow = lrow + pl.program_id(1) * tile_h        # global row index
        up_row = up_ref[:, 7:8, :].astype(jnp.float32)   # x at global row j*th - 1
        dn_row = dn_ref[:, 0:1, :].astype(jnp.float32)   # x at global row (j+1)*th
        ul, ur = _col_neighbors(up_row, reflect, use_roll)
        dl, dr = _col_neighbors(dn_row, reflect, use_roll)
        dh_up_f, s_up_f = ur - ul, _C3 * (ur + ul) + _C10 * up_row
        dh_dn_f, s_dn_f = dr - dl, _C3 * (dr + dl) + _C10 * dn_row

    # gx = 3/32 * (dh[r-1] + dh[r+1]) + 10/32 * dh[r]
    dh_u_raw, dh_d_raw = _row_shift(dh, use_roll)
    dh_u, dh_d = _apply_row_edges(dh_u_raw, dh_d_raw, dh_up_f, dh_dn_f, lrow, grow,
                                  tile_h, h_total, reflect, single_tile)
    gx_ref[...] = (_C3 * (dh_u + dh_d) + _C10 * dh).astype(gx_ref.dtype)

    # gy = s[r+1] - s[r-1]
    s_u_raw, s_d_raw = _row_shift(s, use_roll)
    s_u, s_d = _apply_row_edges(s_u_raw, s_d_raw, s_up_f, s_dn_f, lrow, grow,
                                tile_h, h_total, reflect, single_tile)
    gy_ref[...] = (s_d - s_u).astype(gy_ref.dtype)


# --------------------------------------------------------------------------
# Tiling policy.
# --------------------------------------------------------------------------
def _plan(nc, h, w, itemsize, force_tile_h=None):
    """Choose (channel_batch, row_tile, n_row_tiles, single_tile, vmem_limit)."""
    try:
        vmem_cap = int(pltpu.get_tpu_info().vmem_capacity_bytes)
    except Exception:  # interpret mode / query unsupported
        vmem_cap = 128 * 1024 * 1024
    # Size tiles against 3/8 of physical VMEM (24 MiB on v7x, 48 MiB on
    # v5e/v6e); scoped limit at 1/2 so double buffers + temps keep headroom.
    budget = (vmem_cap * 3) // 8
    vmem_limit = vmem_cap // 2

    # Only the input block and the two output blocks are double-buffered by
    # the pipeline; the f32 temporaries are single-buffered.
    io_bytes = 2 * 3 * itemsize
    tmp_bytes = 10 * 4
    halo_bytes = 2 * 2 * 8 * w * itemsize          # two (8, W) halo views, 2 bufs
    per_row = w * (io_bytes + tmp_bytes)

    def step_bytes(bc, th):
        return bc * (th * per_row + halo_bytes)

    if force_tile_h is not None:
        tile_h = max(8, (int(force_tile_h) // 8) * 8)
    elif step_bytes(1, h) <= budget:
        tile_h = h                                 # whole plane per grid step
    else:
        # Row-tile with a 1-row halo so huge planes fit VMEM (mandatory on
        # v7x's 64 MiB VMEM for >= ~2 Mpx f32 planes).
        tile_h = max(8, (((budget - halo_bytes) // per_row) // 8) * 8)
        # TODO(synk): also tile W (multiples of 128) if even an 8-row tile
        # exceeds the budget (extremely wide planes).

    if tile_h >= h:
        tile_h, n_h, single_tile = h, 1, True
    else:
        n_h, single_tile = pl.cdiv(h, tile_h), False

    # Channel batching: as large as the budget allows, but keep >= ~8 total
    # grid steps (>= 4 per TensorCore on v7x) so both cores stay pipelined.
    # No divisibility requirement -- Pallas masks the ragged last block.
    max_bc = max(1, budget // max(1, step_bytes(1, tile_h)))
    want_blocks = max(1, pl.cdiv(8, n_h))
    bc = max(1, min(nc, max_bc, pl.cdiv(nc, want_blocks)))
    return bc, tile_h, n_h, single_tile, vmem_limit


# --------------------------------------------------------------------------
# pallas_call wrapper.
# --------------------------------------------------------------------------
def _image_gradient_impl(x, reflect_padding, force_tile_h, use_roll):
    N, C, H, W = x.shape
    NC = N * C
    x_flat = x.reshape(NC, H, W)

    bc, th, n_h, single_tile, vmem_limit = _plan(NC, H, W, x.dtype.itemsize,
                                                 force_tile_h)

    kernel = functools.partial(_grad_kernel, reflect=reflect_padding, h_total=H,
                               tile_h=th, single_tile=single_tile,
                               use_roll=use_roll)

    in_specs = [pl.BlockSpec((bc, th, W), lambda i, j: (i, j, 0))]
    operands = [x_flat]
    if not single_tile:
        th8 = th // 8
        n8 = pl.cdiv(H, 8)
        # 8-row halo views of the same input: previous tile's last row and
        # next tile's first row; block index clamped at the image edges (the
        # clamped rows are never consumed -- the global-edge fixup wins).
        in_specs.append(pl.BlockSpec(
            (bc, 8, W), lambda i, j: (i, jnp.maximum(j * th8 - 1, 0), 0)))
        in_specs.append(pl.BlockSpec(
            (bc, 8, W), lambda i, j: (i, jnp.minimum((j + 1) * th8, n8 - 1), 0)))
        operands += [x_flat, x_flat]

    gx, gy = pl.pallas_call(
        kernel,
        out_shape=(jax.ShapeDtypeStruct((NC, H, W), x.dtype),
                   jax.ShapeDtypeStruct((NC, H, W), x.dtype)),
        grid=(pl.cdiv(NC, bc), n_h),
        in_specs=in_specs,
        out_specs=(pl.BlockSpec((bc, th, W), lambda i, j: (i, j, 0)),
                   pl.BlockSpec((bc, th, W), lambda i, j: (i, j, 0))),
        compiler_params=pltpu.CompilerParams(
            dimension_semantics=("parallel", "parallel"),
            vmem_limit_bytes=int(vmem_limit),
        ),
    )(*operands)

    return gx.reshape(N, C, H, W), gy.reshape(N, C, H, W)


_ROLL_OK = None


def _roll_probe_kernel(x_ref, o_ref):
    o_ref[...] = pltpu.roll(pltpu.roll(x_ref[...], 1, axis=0), 1, axis=1)


def _roll_supported():
    """pltpu.roll support / direction varies by shape & toolchain; probe once."""
    global _ROLL_OK
    if _ROLL_OK is None:
        try:
            x = jnp.arange(8 * 128, dtype=jnp.float32).reshape(8, 128)
            got = pl.pallas_call(
                _roll_probe_kernel,
                out_shape=jax.ShapeDtypeStruct((8, 128), jnp.float32))(x)
            want = jnp.roll(jnp.roll(x, 1, axis=0), 1, axis=1)
            _ROLL_OK = bool(jnp.array_equal(jax.block_until_ready(got), want))
        except Exception:
            _ROLL_OK = False
    return _ROLL_OK


def image_gradient(x, reflect_padding=True, force_tile_h=None):
    """x: (N, C, H, W) -> (gx, gy), matching ImageGradientModule.forward."""
    use_roll = _roll_supported()
    try:
        gx, gy = _image_gradient_impl(x, reflect_padding, force_tile_h, use_roll)
        if use_roll:
            jax.block_until_ready((gx, gy))
        return gx, gy
    except Exception:
        if not use_roll:
            raise
        # Mosaic rejected the roll-based formulation for this shape; fall back
        # to the slice+concat formulation (identical math).
        return _image_gradient_impl(x, reflect_padding, force_tile_h, False)


# --------------------------------------------------------------------------
# Pure-JAX reference and smoke tests.
# --------------------------------------------------------------------------
def _reference(x, reflect_padding=True):
    """Matches torch.nn.functional.conv2d(pad(x), kernel, groups=C)."""
    N, C, H, W = x.shape
    mode = "reflect" if reflect_padding else "constant"
    xp = jnp.pad(x, ((0, 0), (0, 0), (1, 1), (1, 1)), mode=mode)
    kx = jnp.tile(KERNEL_X.reshape(1, 1, 3, 3), (C, 1, 1, 1)).astype(x.dtype)
    ky = jnp.tile(KERNEL_Y.reshape(1, 1, 3, 3), (C, 1, 1, 1)).astype(x.dtype)
    dn = jax.lax.conv_dimension_numbers(xp.shape, kx.shape, ("NCHW", "OIHW", "NCHW"))
    gx = jax.lax.conv_general_dilated(
        xp, kx, (1, 1), "VALID", dimension_numbers=dn, feature_group_count=C)
    gy = jax.lax.conv_general_dilated(
        xp, ky, (1, 1), "VALID", dimension_numbers=dn, feature_group_count=C)
    return gx, gy


if __name__ == "__main__":
    key = jax.random.PRNGKey(0)

    cases = [
        # (shape, force_tile_h)
        ((2, 4, 16, 16), None),     # single-tile path (primary smoke shape)
        ((1, 5, 32, 16), 8),        # row-tiled path + ragged channel block
        ((1, 2, 32, 128), 16),      # row-tiled path, lane-aligned W
    ]
    for shape, tile_h in cases:
        x = jax.random.normal(key, shape, dtype=jnp.float32)
        for reflect in (True, False):
            gx, gy = image_gradient(x, reflect_padding=reflect, force_tile_h=tile_h)
            gx, gy = jax.block_until_ready((gx, gy))
            gx_ref, gy_ref = _reference(x, reflect_padding=reflect)
            assert gx.shape == shape and gy.shape == shape
            assert jnp.allclose(gx, gx_ref, atol=1e-5, rtol=1e-5), (
                f"gx mismatch shape={shape} reflect={reflect} tile_h={tile_h}")
            assert jnp.allclose(gy, gy_ref, atol=1e-5, rtol=1e-5), (
                f"gy mismatch shape={shape} reflect={reflect} tile_h={tile_h}")

    # bf16 inputs: kernel accumulates in f32 and casts at the store; compare
    # against the f32 reference at bf16-level tolerance.
    xb = jax.random.normal(key, (2, 4, 16, 16), dtype=jnp.float32).astype(jnp.bfloat16)
    gxb, gyb = image_gradient(xb, reflect_padding=True)
    gxb, gyb = jax.block_until_ready((gxb, gyb))
    gx_ref, gy_ref = _reference(xb.astype(jnp.float32), reflect_padding=True)
    assert jnp.allclose(gxb.astype(jnp.float32), gx_ref, atol=5e-2), "gx bf16 mismatch"
    assert jnp.allclose(gyb.astype(jnp.float32), gy_ref, atol=5e-2), "gy bf16 mismatch"

    print("KERNEL_OK")
</pallas_src>

<mosaic_0001>
module attributes {stable_mosaic.version = 11 : i64} {
  func.func @_roll_probe_kernel(%arg0: memref<8x128xf32, #tpu.memory_space<vmem>>, %arg1: memref<8x128xf32, #tpu.memory_space<vmem>>) attributes {dimension_semantics = [], scalar_prefetch = 0 : i64, scratch_operands = 0 : i64, tpu.core_type = #tpu.core_type<tc>} {
    %c0 = arith.constant 0 : index
    %c0_0 = arith.constant 0 : index
    %0 = vector.load %arg0[%c0, %c0_0] : memref<8x128xf32, #tpu.memory_space<vmem>>, vector<8x128xf32>
    %c1_i32 = arith.constant 1 : i32
    %1 = tpu.dynamic_rotate %0 by %c1_i32 dim 0 : vector<8x128xf32>, i32 -> vector<8x128xf32>
    %c1_i32_1 = arith.constant 1 : i32
    %2 = tpu.dynamic_rotate %1 by %c1_i32_1 dim 1 : vector<8x128xf32>, i32 -> vector<8x128xf32>
    %c0_2 = arith.constant 0 : index
    %c0_3 = arith.constant 0 : index
    %3 = vector.load %arg1[%c0_2, %c0_3] : memref<8x128xf32, #tpu.memory_space<vmem>>, vector<8x128xf32>
    tpu.vector_store %arg1[%c0_2, %c0_3], %2 {strides = array<i32>} : memref<8x128xf32, #tpu.memory_space<vmem>>, vector<8x128xf32>,
    return
  }
}

module attributes {stable_mosaic.version = 11 : i64} {
  func.func @_grad_kernel(%arg0: i32, %arg1: i32, %arg2: memref<1x16x16xf32, #tpu.memory_space<vmem>>, %arg3: memref<1x16x16xf32, #tpu.memory_space<vmem>>, %arg4: memref<1x16x16xf32, #tpu.memory_space<vmem>>) attributes {dimension_semantics = [#tpu.dimension_semantics<parallel>, #tpu.dimension_semantics<parallel>], iteration_bounds = array<i64: 8, 1>, scalar_prefetch = 0 : i64, scratch_operands = 0 : i64, tpu.core_type = #tpu.core_type<tc>, window_params = [{transform_indices = @transform_0, window_bounds = array<i64: 1, 16, 16>}, {transform_indices = @transform_1, window_bounds = array<i64: 1, 16, 16>}, {transform_indices = @transform_2, window_bounds = array<i64: 1, 16, 16>}]} {
    %c0 = arith.constant 0 : index
    %c0_0 = arith.constant 0 : index
    %c0_1 = arith.constant 0 : index
    %0 = vector.load %arg2[%c0, %c0_0, %c0_1] : memref<1x16x16xf32, #tpu.memory_space<vmem>>, vector<1x16x16xf32>
    %1 = vector.extract_strided_slice %0 {offsets = [0, 0, 1], sizes = [1, 16, 1], strides = [1, 1, 1]} : vector<1x16x16xf32> to vector<1x16x1xf32>
    %2 = vector.extract_strided_slice %0 {offsets = [0, 0, 14], sizes = [1, 16, 1], strides = [1, 1, 1]} : vector<1x16x16xf32> to vector<1x16x1xf32>
    %3 = vector.extract_strided_slice %0 {offsets = [0, 0, 0], sizes = [1, 16, 15], strides = [1, 1, 1]} : vector<1x16x16xf32> to vector<1x16x15xf32>
    %4 = tpu.concatenate %1, %3 in 2 : vector<1x16x1xf32>, vector<1x16x15xf32> -> vector<1x16x16xf32>
    %5 = vector.extract_strided_slice %0 {offsets = [0, 0, 1], sizes = [1, 16, 15], strides = [1, 1, 1]} : vector<1x16x16xf32> to vector<1x16x15xf32>
    %6 = tpu.concatenate %5, %2 in 2 : vector<1x16x15xf32>, vector<1x16x1xf32> -> vector<1x16x16xf32>
    %7 = arith.subf %6, %4 : vector<1x16x16xf32>
    %8 = arith.addf %6, %4 : vector<1x16x16xf32>
    %cst = arith.constant 9.375000e-02 : f32
    %9 = vector.broadcast %cst : f32 to vector<1x16x16xf32>
    %10 = arith.mulf %9, %8 : vector<1x16x16xf32>
    %cst_2 = arith.constant 3.125000e-01 : f32
    %11 = vector.broadcast %cst_2 : f32 to vector<1x16x16xf32>
    %12 = arith.mulf %11, %0 : vector<1x16x16xf32>
    %13 = arith.addf %10, %12 : vector<1x16x16xf32>
    %14 = tpu.iota {dimensions = array<i32: 1>} : vector<1x16x16xi32>
    %15 = vector.extract_strided_slice %7 {offsets = [0, 0, 0], sizes = [1, 1, 16], strides = [1, 1, 1]} : vector<1x16x16xf32> to vector<1x1x16xf32>
    %16 = vector.extract_strided_slice %7 {offsets = [0, 0, 0], sizes = [1, 15, 16], strides = [1, 1, 1]} : vector<1x16x16xf32> to vector<1x15x16xf32>
    %17 = tpu.concatenate %15, %16 in 1 : vector<1x1x16xf32>, vector<1x15x16xf32> -> vector<1x16x16xf32>
    %18 = vector.extract_strided_slice %7 {offsets = [0, 1, 0], sizes = [1, 15, 16], strides = [1, 1, 1]} : vector<1x16x16xf32> to vector<1x15x16xf32>
    %19 = vector.extract_strided_slice %7 {offsets = [0, 15, 0], sizes = [1, 1, 16], strides = [1, 1, 1]} : vector<1x16x16xf32> to vector<1x1x16xf32>
    %20 = tpu.concatenate %18, %19 in 1 : vector<1x15x16xf32>, vector<1x1x16xf32> -> vector<1x16x16xf32>
    %c0_i32 = arith.constant 0 : i32
    %21 = vector.broadcast %c0_i32 : i32 to vector<1x16x16xi32>
    %22 = arith.cmpi eq, %14, %21 : vector<1x16x16xi32>
    %23 = arith.select %22, %20, %17 : vector<1x16x16xi1>, vector<1x16x16xf32>
    %c15_i32 = arith.constant 15 : i32
    %24 = vector.broadcast %c15_i32 : i32 to vector<1x16x16xi32>
    %25 = arith.cmpi eq, %14, %24 : vector<1x16x16xi32>
    %26 = arith.select %25, %17, %20 : vector<1x16x16xi1>, vector<1x16x16xf32>
    %27 = arith.addf %23, %26 : vector<1x16x16xf32>
    %cst_3 = arith.constant 9.375000e-02 : f32
    %28 = vector.broadcast %cst_3 : f32 to vector<1x16x16xf32>
    %29 = arith.mulf %28, %27 : vector<1x16x16xf32>
    %cst_4 = arith.constant 3.125000e-01 : f32
    %30 = vector.broadcast %cst_4 : f32 to vector<1x16x16xf32>
    %31 = arith.mulf %30, %7 : vector<1x16x16xf32>
    %32 = arith.addf %29, %31 : vector<1x16x16xf32>
    %c0_5 = arith.constant 0 : index
    %c0_6 = arith.constant 0 : index
    %c0_7 = arith.constant 0 : index
    %33 = vector.load %arg3[%c0_5, %c0_6, %c0_7] : memref<1x16x16xf32, #tpu.memory_space<vmem>>, vector<1x16x16xf32>
    tpu.vector_store %arg3[%c0_5, %c0_6, %c0_7], %32 {strides = array<i32>} : memref<1x16x16xf32, #tpu.memory_space<vmem>>, vector<1x16x16xf32>,
    %34 = vector.extract_strided_slice %13 {offsets = [0, 0, 0], sizes = [1, 1, 16], strides = [1, 1, 1]} : vector<1x16x16xf32> to vector<1x1x16xf32>
    %35 = vector.extract_strided_slice %13 {offsets = [0, 0, 0], sizes = [1, 15, 16], strides = [1, 1, 1]} : vector<1x16x16xf32> to vector<1x15x16xf32>
    %36 = tpu.concatenate %34, %35 in 1 : vector<1x1x16xf32>, vector<1x15x16xf32> -> vector<1x16x16xf32>
    %37 = vector.extract_strided_slice %13 {offsets = [0, 1, 0], sizes = [1, 15, 16], strides = [1, 1, 1]} : vector<1x16x16xf32> to vector<1x15x16xf32>
    %38 = vector.extract_strided_slice %13 {offsets = [0, 15, 0], sizes = [1, 1, 16], strides = [1, 1, 1]} : vector<1x16x16xf32> to vector<1x1x16xf32>
    %39 = tpu.concatenate %37, %38 in 1 : vector<1x15x16xf32>, vector<1x1x16xf32> -> vector<1x16x16xf32>
    %c0_i32_8 = arith.constant 0 : i32
    %40 = vector.broadcast %c0_i32_8 : i32 to vector<1x16x16xi32>
    %41 = arith.cmpi eq, %14, %40 : vector<1x16x16xi32>
    %42 = arith.select %41, %39, %36 : vector<1x16x16xi1>, vector<1x16x16xf32>
    %c15_i32_9 = arith.constant 15 : i32
    %43 = vector.broadcast %c15_i32_9 : i32 to vector<1x16x16xi32>
    %44 = arith.cmpi eq, %14, %43 : vector<1x16x16xi32>
    %45 = arith.select %44, %36, %39 : vector<1x16x16xi1>, vector<1x16x16xf32>
    %46 = arith.subf %45, %42 : vector<1x16x16xf32>
    %c0_10 = arith.constant 0 : index
    %c0_11 = arith.constant 0 : index
    %c0_12 = arith.constant 0 : index
    %47 = vector.load %arg4[%c0_10, %c0_11, %c0_12] : memref<1x16x16xf32, #tpu.memory_space<vmem>>, vector<1x16x16xf32>
    tpu.vector_store %arg4[%c0_10, %c0_11, %c0_12], %46 {strides = array<i32>} : memref<1x16x16xf32, #tpu.memory_space<vmem>>, vector<1x16x16xf32>,
    return
  }
  func.func @transform_0(%arg0: i32, %arg1: i32) -> (i32, i32, i32) {
    %c0_i32 = arith.constant 0 : i32
    %c0_i32_0 = arith.constant 0 : i32
    return %arg0, %arg1, %c0_i32 : i32, i32, i32
  }
  func.func @transform_1(%arg0: i32, %arg1: i32) -> (i32, i32, i32) {
    %c0_i32 = arith.constant 0 : i32
    %c0_i32_0 = arith.constant 0 : i32
    return %arg0, %arg1, %c0_i32 : i32, i32, i32
  }
  func.func @transform_2(%arg0: i32, %arg1: i32) -> (i32, i32, i32) {
    %c0_i32 = arith.constant 0 : i32
    %c0_i32_0 = arith.constant 0 : i32
    return %arg0, %arg1, %c0_i32 : i32, i32, i32
  }
}

</mosaic_0001>

<bundles_post_ra>
// kernel: tpu_custom_call.1
= control target key start
LH: loop header
LB: loop body
LE: loop exit
PB: predicated region body
PF: predicated region fallthrough
CT: control target
= control target key end

     0   :  { %6 = vsyncpa [#allocation3], 0  ;;  %s107_s0 = inlined_call_operand.hbm [shape: f32[8,128], index: 0, kind: input, shape index: {}]   ;;  %s108_s1 = inlined_call_operand.hbm [shape: f32[8,128], index: 1, kind: output, shape index: {}]  }
   0x1   :  { %7 = vsyncpa [#allocation4], 0  ;;  %s88_s6 = smov [#allocation2]  }
   0x2   :  { %s14_s7 = sshll.u32 %s88_s6, 4  ;;  %s15_s7 = int_to_ptr.vmem [resolvable:$true] %s14_s7 }
   0x3   :  { %s52_s8 = scalar_lea.vmem %s15_s7, 128  ;;  %p57_p1 = scmp.lt.s32.totalorder %s15_s7, %s15_s7 }
   0x4   :  { %p53_p0 = scmp.ne.s32.totalorder %s15_s7, %s52_s8  ;;  %p58_p2 = scmp.lt.s32.totalorder %s52_s8, %s52_s8 }
   0x6   :  { %p59_p3 = por %p58_p2, %p57_p1 }
   0x8   :  { %p60_p4 = pnand %p59_p3, %p53_p0 }
   0xa   :  { %63 = shalt.err (!%p60_p4)
}
   0xb   :  { %17 = dma.hbm_to_vmem [thread:$0]  %s107_s0, 128, %s15_s7, [#allocation3]  }
   0xc   :  { %84 = dma.done.wait [#allocation3], 128  }
   0xd   :  { %85 = vsyncadd [#allocation3], 4294967168  ;;  %v21_v0 = vld [vmem:[#allocation2] sm:$0xff]  ;;  %s89_s11 = smov 1   ;;  %s90_s12 = smov [#allocation5]  }
   0xe   :  { %v22_v1 = vrot.slane %v21_v0, 7  ;;  %s32_s13 = sshll.u32 %s90_s12, 4  ;;  %s33_s13 = int_to_ptr.vmem [resolvable:$true] %s32_s13 }
   0xf   :  { %s64_s14 = scalar_lea.vmem %s33_s13, 128  ;;  %p69_p6 = scmp.lt.s32.totalorder %s33_s13, %s33_s13 }
  0x10   :  { %23 = vrot.lane.b32.xlu0 %v22_v1, %s89_s11  ;;  %p65_p5 = scmp.ne.s32.totalorder %s33_s13, %s64_s14  ;;  %p70_p7 = scmp.lt.s32.totalorder %s64_s14, %s64_s14 }
  0x12   :  { %p71_p8 = por %p70_p7, %p69_p6 }
  0x14   :  { %p72_p9 = pnand %p71_p8, %p65_p5 }
  0x82   :  { %v24_v2 = vpop.permute.xlu0 %23 }
  0x83   :  { %25 = vst [vmem:[#allocation5] sm:$0xff] %v24_v2 }
  0x84   :  { %75 = shalt.err (!%p72_p9)
}
  0x85   :  { %35 = dma.vmem_to_hbm [thread:$0]  %s33_s13, 128, %s108_s1, [#allocation4]  }
  0x86   :  { %86 = dma.done.wait [#allocation4], 128  }
  0x87   :  { %87 = vsyncadd [#allocation4], 4294967168 }
  0x88   :  { %39 = vsyncpa [#allocation3], 1 }
  0x89   :  { %40 = vsyncpa [#allocation4], 1 }

// kernel: tpu_custom_call.1
= control target key start
LH: loop header
LB: loop body
LE: loop exit
PB: predicated region body
PF: predicated region fallthrough
CT: control target
= control target key end

     0   :  { %8 = vsyncpa [#allocation3], 0  ;;  %s907_s0 = inlined_call_operand.hbm [shape: f32[8,16,16], index: 0, kind: input, shape index: {}]   ;;  %s908_s1 = inlined_call_operand.hbm [shape: f32[8,16,16], index: 1, kind: output, shape index: {0}]   ;;  %s909_s2 = inlined_call_operand.hbm [shape: f32[8,16,16], index: 2, kind: output, shape index: {1}]  }
   0x1   :  { %10 = vsyncpa [#allocation3 + $0x1], 0 }
   0x2   :  { %11 = vsyncpa [#allocation4], 0 }
   0x3   :  { %13 = vsyncpa [#allocation4 + $0x1], 0 }
   0x4   :  { %14 = vsyncpa [#allocation7], 0 }
   0x5   :  { %16 = vsyncpa [#allocation7 + $0x1], 0  ;;  %s708_s9 = smov 0   ;;  %s710_s10 = smov 0  }
   0x6   :  { %s712_s11 = smov 0   ;;  %s714_s12 = smov 0  }
   0x7   :  { %s716_s13 = smov 0   ;;  %s718_s14 = smov 0  }
   0x8 LB: > { %s449_s15 = sadd.s32 4294967295, %s682_s14   ;;  %s450_s16 = sadd.s32 4294967294, %s682_s14   ;;  %s682_s14 = sphi %s718_s14, %s22_s14   ;;  %s678_s13 = sphi %s716_s13, %s919_s13   ;;  %s674_s12 = sphi %s714_s12, %s918_s12   ;;  %s670_s11 = sphi %s712_s11, %s917_s11   ;;  %s666_s10 = sphi %s710_s10, %s916_s10   ;;  %s662_s9 = sphi %s708_s9, %s915_s9  }
   0x9   : > { %s34_s17 = sadd.s32 1, %s678_s13  ;;  %s43_s18 = sadd.s32 1, %s670_s11 }
   0xa   : > { %p36_p0 = scmp.ge.s32.totalorder %s34_s17, 8  ;;  %p50_p1 = scmp.ne.s32.totalorder %s670_s11, %s666_s10 }
   0xb   : > { %p51_p2 = scmp.eq.s32.totalorder %s682_s14, 0  ;;  %p56_p3 = scmp.ne.s32.totalorder %s666_s10, %s662_s9 }
   0xc   : > { %s921_s17 = smov (%p36_p0, %s34_s17), 0  ;;  %p57_p5 = scmp.eq.s32.totalorder %s449_s15, 0 }
   0xd   : > { %p749_p4 = por %p51_p2, %p50_p1  ;;  %s38_s20 = ssub.s32 %s678_s13, %s921_s17 }
   0xe   : > { %p82_p6 = scmp.eq.s32.totalorder %s449_s15, 7  ;;  %p41_p7 = scmp.eq.s32.totalorder %s38_s20, 0 }
   0xf   : > { %p755_p8 = por %p57_p5, %p56_p3  ;;  %p88_p10 = scmp.eq.s32.totalorder %s450_s16, 7 }
  0x10   : > { %p759_p9 = por %p82_p6, %p50_p1  ;;  %p488_p12 = scmp.lt.s32.totalorder %s682_s14, 8 }
  0x11   : > { %s764_s23 = scalar_select %p41_p7, %s670_s11, %s43_s18  }
  0x12   : > { %p766_p11 = por %p88_p10, %p56_p3  ;;  %s136_s25 = sand.u32 1, %s670_s11  }
  0x13   : > { %s453_s26 = sshll.u32 %s136_s25, 4  ;;  %s468_s27 = sshll.u32 %s678_s13, 8 }
  0x14   : > { %s148_s30 = scalar_lea.hbm %s907_s0, %s468_s27  ;;  %s140_s3 = scalar_lea.vmem [#allocation2], %s453_s26 }
  0x15   : > { %s149_s4 = sshll.u32 %s140_s3, 4  ;;  %p778_p13 = pnand %p488_p12, %p749_p4  ;;  %s150_s4 = int_to_ptr.vmem [resolvable:$true] %s149_s4 }
  0x16   : > { %p456_p0 = scmp.ge.s32.totalorder %s682_s14, 1  ;;  %s137_s6 = scalar_lea.sflag [#allocation3], %s136_s25 }
  0x17   : > { %p546_p1 = pneg %p778_p13  ;;  %s557_s7 = scalar_lea.vmem %s150_s4, 256 }
  0x18   : > { %p558_p2 = scmp.ne.s32.totalorder %s150_s4, %s557_s7  ;;  %s684_s8 = smov [#allocation2]  }
  0x19   : > { %s562_s15 = sshll.u32 %s684_s8, 4  ;;  %s563_s15 = int_to_ptr.vmem [resolvable:$false] %s562_s15 }
  0x1a   : > { %p560_p3 = pnand %p558_p2, %p546_p1  ;;  %s564_s16 = scalar_lea.vmem %s563_s15, 512 }
  0x1b   : > { %p565_p6 = scmp.lt.s32.totalorder %s150_s4, %s563_s15  ;;  %p566_p7 = scmp.lt.s32.totalorder %s564_s16, %s557_s7 }
  0x1c   : > { %p561_p5 = pneg %p560_p3 }
  0x1d   : > { %p567_p10 = por %p566_p7, %p565_p6 }
  0x1f   : > { %p568_p4 = pnand %p567_p10, %p561_p5 }
  0x21   : > { %571 = shalt.err (!%p568_p4)
}
  0x22   : > { %s685_s18 = smov 128   ;;  %s686_s19 = smov 8  }
  0x23   : > { %480 = dma.hbm_to_vmem [thread:$0]  (!%p778_p13), %s148_s30, 256, %s150_s4, %s137_s6, %s685_s18, %s685_s18, %s686_s19  }
  0x24   : > { %p157_p12 = scmp.lt.s32.totalorder %s682_s14, 9 }
  0x26   : > { %p158_p1 = pnand %p456_p0, %p157_p12 }
  0x27   : > { %s791_s20 = sand.u32 (!%p158_p1), 1, %s666_s10  }
  0x28   : > { %161 = sbr.rel (%p158_p1) target bundleno = 216 (0xd8), region = 24  ;;  %s794_s25 = sshll.u32 (!%p158_p1), %s791_s20, 4 }
  0x29   : > { %s164_s26 = scalar_lea.sflag (!%p158_p1), [#allocation3], %s791_s20  ;;  %s167_s27 = scalar_lea.vmem (!%p158_p1), [#allocation2], %s794_s25 }
  0x2d   : > { %649 = dma.done.wait (%p755_p8), %s164_s26, 256  }
  0x2e   : > { %651 = vsyncadd (%p755_p8), %s164_s26, 4294967040  ;;  %v196_v0 = vld [vmem:[%s167_s27] sm:$0xff]  ;;  %s687_s28 = smov 1   ;;  %s688_s29 = smov 127   ;;  %v197_v1 = vld [vmem:[%s167_s27 + $0x8] sm:$0xff]  ;;  %v228_v2 = vlaneseq  ;;  %vm212_vm0 = vcmask 7168  }
  0x2f   : > { %206 = vrot.lane.b32.xlu1 %v196_v0, %s687_s28  ;;  %200 = vrot.lane.b32.xlu0 %v196_v0, %s688_s29  ;;  %vm215_vm1 = vcmask 121856   ;;  %v224_v8 = vmul.f32 0.3125, %v196_v0  ;;  %v225_v17 = vmul.f32 0.3125, %v197_v1  ;;  %vm233_vm2 = vcmask 1040384   ;;  %s469_s21 = sshll.u32 %s674_s12, 8  ;;  %s185_s30 = scalar_lea.vmem [#allocation5], %s794_s25 }
  0x30   : > { %v229_v7 = vshrl.u32 %v228_v2, 7  ;;  %vm240_vm3 = vcmask 1046528   ;;  %vm263_vm6 = vcmask 130048   ;;  %s309_s3 = sshll.u32 %s185_s30, 4  ;;  %s192_s4 = scalar_lea.vmem [#allocation6], %s794_s25  ;;  %s829_s3 = int_to_ptr.vmem [resolvable:$true] %s309_s3 }
  0x31   : > { %s327_s5 = sshll.u32 %s192_s4, 4  ;;  %s820_s7 = scalar_lea.hbm %s909_s2, %s469_s21  ;;  %s822_s5 = int_to_ptr.vmem [resolvable:$true] %s327_s5 }
  0x32   : > { %v230_v14 = vadd.s32 8, %v229_v7  ;;  %vm247_vm4 = vcmp.eq.s32.totalorder %v229_v7, 0  ;;  %s827_s16 = scalar_lea.hbm %s908_s1, %s469_s21  ;;  %s294_s18 = scalar_lea.sflag [#allocation7], %s791_s20 }
  0x33   : > { %208 = vrot.lane.b32.xlu1 %v197_v1, %s687_s28  ;;  %202 = vrot.lane.b32.xlu0 %v197_v1, %s688_s29  ;;  %s572_s19 = scalar_lea.vmem %s822_s5, 256  ;;  %s689_s25 = smov [#allocation6]  }
  0x34   : > { %vm252_vm5 = vcmp.eq.s32.totalorder %v230_v14, 15  ;;  %p573_p8 = scmp.ne.s32.totalorder %s822_s5, %s572_s19  ;;  %s576_s26 = sshll.u32 %s689_s25, 4  ;;  %s577_s26 = int_to_ptr.vmem [resolvable:$false] %s576_s26 }
  0x35   : > { %s578_s27 = scalar_lea.vmem %s577_s26, 512  ;;  %p579_p2 = scmp.lt.s32.totalorder %s822_s5, %s577_s26 }
  0x36   : > { %p574_p13 = pnand %p573_p8, %p759_p9  ;;  %p580_p3 = scmp.lt.s32.totalorder %s578_s27, %s572_s19 }
  0x38   : > { %p575_p0 = pneg %p574_p13  ;;  %p581_p5 = por %p580_p3, %p579_p2 }
  0x3a   : > { %p582_p6 = pnand %p581_p5, %p575_p0 }
  0xa1   : > { %v207_v3 = vpop.permute.xlu1 %206  ;;  %v201_v4 = vpop.permute.xlu0 %200 }
  0xa2   : > { %v213_v5 = vsel %vm212_vm0, %v201_v4, %v207_v3  ;;  %v216_v6 = vsel %vm215_vm1, %v201_v4, %v207_v3 }
  0xa3   : > { %v220_v9 = vadd.f32 %v216_v6, %v213_v5  ;;  %v218_v10 = vsub.f32 %v216_v6, %v213_v5 }
  0xa5   : > { %v222_v11 = vmul.f32 0.09375, %v220_v9  ;;  %v209_v12 = vpop.permute.xlu1 %208  ;;  %v203_v13 = vpop.permute.xlu0 %202  ;;  %v234_v21 = vrot.slane %v218_v10, 7  ;;  %v241_v24 = vrot.slane %v218_v10, 1  ;;  %v259_v37 = vmul.f32 0.3125, %v218_v10 }
  0xa6   : > { %v214_v15 = vsel %vm212_vm0, %v203_v13, %v209_v12  ;;  %v217_v16 = vsel %vm215_vm1, %v203_v13, %v209_v12 }
  0xa7   : > { %v226_v18 = vadd.f32 %v224_v8, %v222_v11  ;;  %v219_v19 = vsub.f32 %v217_v16, %v214_v15  ;;  %v221_v20 = vadd.f32 %v217_v16, %v214_v15  ;;  %v239_v29 = vsel %vm233_vm2, %v218_v10, %v234_v21 }
  0xa9   : > { %v223_v22 = vmul.f32 0.09375, %v221_v20  ;;  %v235_v23 = vrot.slane %v219_v19, 7  ;;  %v242_v25 = vrot.slane %v219_v19, 1  ;;  %v268_v26 = vrot.slane %v226_v18, 7 }
  0xaa   : > { %v274_v30 = vrot.slane %v226_v18, 1  ;;  %v260_v40 = vmul.f32 0.3125, %v219_v19 }
  0xab   : > { %v227_v27 = vadd.f32 %v225_v17, %v223_v22  ;;  %v236_v28 = vsel %vm233_vm2, %v234_v21, %v235_v23  ;;  %v243_v31 = vsel %vm240_vm3, %v241_v24, %v242_v25  ;;  %v246_v32 = vsel %vm240_vm3, %v242_v25, %v219_v19 }
  0xac   : > { %v249_v33 = vsel %vm247_vm4, %v243_v31, %v239_v29  ;;  %v254_v34 = vsel %vm252_vm5, %v236_v28, %v246_v32  ;;  %v273_v41 = vsel %vm233_vm2, %v226_v18, %v268_v26 }
  0xad   : > { %v269_v35 = vrot.slane %v227_v27, 7  ;;  %v275_v36 = vrot.slane %v227_v27, 1  ;;  %v255_v38 = vadd.f32 %v249_v33, %v243_v31  ;;  %v256_v39 = vadd.f32 %v254_v34, %v236_v28 }
  0xaf   : > { %v270_v42 = vsel %vm233_vm2, %v268_v26, %v269_v35  ;;  %v276_v43 = vsel %vm240_vm3, %v274_v30, %v275_v36  ;;  %v279_v44 = vsel %vm240_vm3, %v275_v36, %v227_v27  ;;  %v257_v45 = vmul.f32 0.09375, %v255_v38 }
  0xb0   : > { %v258_v46 = vmul.f32 0.09375, %v256_v39  ;;  %v280_v47 = vsel %vm247_vm4, %v276_v43, %v273_v41  ;;  %v283_v48 = vsel %vm252_vm5, %v270_v42, %v279_v44 }
  0xb1   : > { %v284_v49 = vsub.f32 %v276_v43, %v280_v47  ;;  %v285_v50 = vsub.f32 %v283_v48, %v270_v42  ;;  %v261_v51 = vadd.f32 %v259_v37, %v257_v45 }
  0xb2   : > { %v262_v52 = vadd.f32 %v260_v40, %v258_v46 }
  0xb3   : > { %286 = vst.msk [vmem:[%s192_s4] sm:$0xff] %vm263_vm6, %v284_v49  ;;  %287 = vst.msk [vmem:[%s192_s4 + $0x8] sm:$0xff] %vm263_vm6, %v285_v50 }
  0xb4   : > { %264 = vst.msk [vmem:[%s185_s30] sm:$0xff] %vm263_vm6, %v261_v51  ;;  %265 = vst.msk [vmem:[%s185_s30 + $0x8] sm:$0xff] %vm263_vm6, %v262_v52 }
  0xb5   : > { %585 = shalt.err (!%p582_p6)
}
  0xb6   : > { %s586_s28 = scalar_lea.hbm %s820_s7, 256  ;;  %s590_s30 = scalar_lea.hbm %s909_s2, 2048 }
  0xb7   : > { %p587_p7 = scmp.ne.s32.totalorder %s820_s7, %s586_s28  ;;  %p591_p12 = scmp.lt.s32.totalorder %s820_s7, %s909_s2 }
  0xb8   : > { %p592_p1 = scmp.lt.s32.totalorder %s590_s30, %s586_s28 }
  0xb9   : > { %p588_p10 = pnand %p587_p7, %p759_p9 }
  0xba   : > { %p593_p8 = por %p592_p1, %p591_p12 }
  0xbb   : > { %p589_p4 = pneg %p588_p10 }
  0xbd   : > { %p594_p13 = pnand %p593_p8, %p589_p4 }
  0xbf   : > { %597 = shalt.err (!%p594_p13)
}
  0xc0   : > { %s690_s6 = smov 128   ;;  %s691_s8 = smov 8  }
  0xc1   : > { %474 = dma.vmem_to_hbm [thread:$0]  (%p759_p9), %s822_s5, 256, %s820_s7, %s294_s18, %s690_s6, %s690_s6, %s691_s8  }
  0xc2   : > { %s289_s15 = scalar_lea.sflag [#allocation4], %s791_s20  ;;  %s598_s19 = scalar_lea.vmem %s829_s3, 256 }
  0xc3   : > { %p599_p0 = scmp.ne.s32.totalorder %s829_s3, %s598_s19  ;;  %s692_s25 = smov [#allocation5]  }
  0xc4   : > { %s602_s26 = sshll.u32 %s692_s25, 4  ;;  %s603_s26 = int_to_ptr.vmem [resolvable:$false] %s602_s26 }
  0xc5   : > { %p600_p2 = pnand %p599_p0, %p759_p9  ;;  %s604_s27 = scalar_lea.vmem %s603_s26, 512 }
  0xc6   : > { %p605_p5 = scmp.lt.s32.totalorder %s829_s3, %s603_s26  ;;  %p606_p6 = scmp.lt.s32.totalorder %s604_s27, %s598_s19 }
  0xc7   : > { %p601_p3 = pneg %p600_p2 }
  0xc8   : > { %p607_p7 = por %p606_p6, %p605_p5 }
  0xca   : > { %p608_p10 = pnand %p607_p7, %p601_p3 }
  0xcc   : > { %611 = shalt.err (!%p608_p10)
}
  0xcd   : > { %s612_s5 = scalar_lea.hbm %s827_s16, 256  ;;  %s616_s18 = scalar_lea.hbm %s908_s1, 2048 }
  0xce   : > { %p613_p4 = scmp.ne.s32.totalorder %s827_s16, %s612_s5  ;;  %p617_p8 = scmp.lt.s32.totalorder %s827_s16, %s908_s1 }
  0xcf   : > { %p618_p13 = scmp.lt.s32.totalorder %s616_s18, %s612_s5 }
  0xd0   : > { %p614_p12 = pnand %p613_p4, %p759_p9 }
  0xd1   : > { %p619_p0 = por %p618_p13, %p617_p8 }
  0xd2   : > { %p615_p1 = pneg %p614_p12 }
  0xd4   : > { %p620_p2 = pnand %p619_p0, %p615_p1 }
  0xd6   : > { %623 = shalt.err (!%p620_p2)
}
  0xd7   : > { %473 = dma.vmem_to_hbm [thread:$0]  (%p759_p9), %s829_s3, 256, %s827_s16, %s289_s15, %s690_s6, %s690_s6, %s691_s8  }
  0xd8 PF: > { %p489_p3 = scmp.ge.s32.totalorder %s682_s14, 2  ;;  %s342_s21 = sand.u32 1, %s662_s9  }
  0xd9   : > { %s343_s30 = scalar_lea.sflag [#allocation4], %s342_s21 }
  0xda   : > { %p482_p5 = pnand %p489_p3, %p766_p11 }
  0xdc   : > { %p483_p6 = pneg %p482_p5 }
  0xde   : > { %653 = dma.done.wait (%p483_p6), %s343_s30, 256  }
  0xdf   : > { %655 = vsyncadd (%p483_p6), %s343_s30, 4294967040  ;;  %s352_s4 = scalar_lea.sflag [#allocation7], %s342_s21 }
  0xe0   : > { %657 = dma.done.wait (%p483_p6), %s352_s4, 256  }
  0xe1   : > { %659 = vsyncadd (%p483_p6), %s352_s4, 4294967040  ;;  %s22_s14 = sadd.s32 1, %s682_s14   ;;  %s915_s9 = smov %s666_s10 }
  0xe2   : > { %p19_p7 = scmp.ge.s32.totalorder %s22_s14, 10   ;;  %s916_s10 = smov %s670_s11 }
  0xe3   : > { %s917_s11 = smov %s764_s23  ;;  %s918_s12 = smov %s678_s13 }
  0xe4   : > { %s919_s13 = smov %s921_s17  ;;  %21 = sbr.rel (!%p19_p7) target bundleno = 8 (0x8), region = 86 }
  0xe9   :  { %357 = vsyncpa [#allocation3], 1 }
  0xea   :  { %359 = vsyncpa [#allocation3 + $0x1], 1 }
  0xeb   :  { %360 = vsyncpa [#allocation4], 1 }
  0xec   :  { %362 = vsyncpa [#allocation4 + $0x1], 1 }
  0xed   :  { %363 = vsyncpa [#allocation7], 1 }
  0xee   :  { %365 = vsyncpa [#allocation7 + $0x1], 1 }

</bundles_post_ra>
